<compile_context>
chip_gen: v7x
topology: tpu7x:2x2x1
jax: 0.10.0
libtpu: 0.0.40
codegen_flags: <defaults>
</compile_context>

<pallas_src>
import jax
import jax.numpy as jnp
from jax.experimental import pallas as pl
from jax.experimental.pallas import tpu as pltpu

HIDDEN_DIM = 25
NCAT = 3
LEAKY_SLOPE = 0.01

H_PAD = 32          # HIDDEN_DIM padded to a sublane multiple
C_PAD = 8           # NCAT padded to a sublane multiple
TB = 256            # batch tile on the lane axis (f32 intermediates ~8 vregs -> no spills)


def _leaky_relu(x):
    return jnp.where(x > 0, x, LEAKY_SLOPE * x)


def _make_kernel(num_parents):
    """Kernel operating in the transposed (feature-major, batch-on-lanes) domain."""

    def kernel(*refs):
        xs = refs[:num_parents]                       # each [in_dim_i, TB]   bf16
        w0s = refs[num_parents:2 * num_parents]       # each [H_PAD, in_dim_i] bf16
        (b0_ref, wa_ref, ba_ref, wb_ref, bb_ref,
         wf_ref, bf_ref, o_ref) = refs[2 * num_parents:]

        # Layer 0: sum of per-parent linears (bias fused into b0), bf16 MXU, f32 acc.
        h = jnp.dot(w0s[0][...], xs[0][...], preferred_element_type=jnp.float32)
        for i in range(1, num_parents):
            h = h + jnp.dot(w0s[i][...], xs[i][...],
                            preferred_element_type=jnp.float32)
        h = _leaky_relu(h + b0_ref[...])              # [H_PAD, TB]; bias [H_PAD,1] broadcasts

        h = _leaky_relu(
            jnp.dot(wa_ref[...], h.astype(jnp.bfloat16),
                    preferred_element_type=jnp.float32) + ba_ref[...])
        h = _leaky_relu(
            jnp.dot(wb_ref[...], h.astype(jnp.bfloat16),
                    preferred_element_type=jnp.float32) + bb_ref[...])
        out = jnp.dot(wf_ref[...], h.astype(jnp.bfloat16),
                      preferred_element_type=jnp.float32) + bf_ref[...]
        o_ref[...] = out.astype(o_ref.dtype)          # lane-dense [C_PAD, TB] store

    return kernel


def init_params(key, parent_dims):
    """torch.nn.Linear-style init U(-1/sqrt(in), 1/sqrt(in)).

    Returns f32 'ref' params (module semantics) and bf16 transposed/padded 'kernel' params.
    """
    ks = jax.random.split(key, 2 * len(parent_dims) + 6)
    it = iter(ks)

    def lin(in_dim, out_dim):
        bound = 1.0 / (in_dim ** 0.5)
        w = jax.random.uniform(next(it), (in_dim, out_dim), jnp.float32, -bound, bound)
        b = jax.random.uniform(next(it), (out_dim,), jnp.float32, -bound, bound)
        return w, b

    parents = [lin(d, HIDDEN_DIM) for d in parent_dims]
    wa, ba = lin(HIDDEN_DIM, HIDDEN_DIM)
    wb, bb = lin(HIDDEN_DIM, HIDDEN_DIM)
    wf, bf = lin(HIDDEN_DIM, NCAT)

    ref = dict(parents=parents, wa=wa, ba=ba, wb=wb, bb=bb, wf=wf, bf=bf)

    def pad_t(w, rows, cols):
        wt = w.T                                       # [out, in]
        return jnp.pad(wt, ((0, rows - wt.shape[0]), (0, cols - wt.shape[1])))

    def pad_b(b, rows):
        return jnp.pad(b, (0, rows - b.shape[0])).reshape(rows, 1)

    kern = {}
    for j, (w, _) in enumerate(parents):
        kern[f"w0T_{j}"] = pad_t(w, H_PAD, w.shape[0]).astype(jnp.bfloat16)
    kern["b0"] = pad_b(sum(b for _, b in parents), H_PAD)          # fused bias, f32
    kern["waT"] = pad_t(wa, H_PAD, H_PAD).astype(jnp.bfloat16)
    kern["ba"] = pad_b(ba, H_PAD)
    kern["wbT"] = pad_t(wb, H_PAD, H_PAD).astype(jnp.bfloat16)
    kern["bb"] = pad_b(bb, H_PAD)
    kern["wfT"] = pad_t(wf, C_PAD, H_PAD).astype(jnp.bfloat16)
    kern["bf"] = pad_b(bf, C_PAD)
    return {"ref": ref, "kernel": kern}


def cat_feed_forward(params, *parent_vals):
    B = parent_vals[0].shape[0]
    P = len(parent_vals)
    n_tiles = pl.cdiv(B, TB)
    b_pad = n_tiles * TB

    # Transpose once in the wrapper (batch -> lane axis), pad ragged batch, cast to bf16.
    xs_t = [jnp.pad(x.T, ((0, 0), (0, b_pad - B))).astype(jnp.bfloat16)
            for x in parent_vals]

    kp = params["kernel"]
    w0_args = [kp[f"w0T_{j}"] for j in range(P)]
    const_args = [kp["b0"], kp["waT"], kp["ba"], kp["wbT"], kp["bb"],
                  kp["wfT"], kp["bf"]]

    x_specs = [pl.BlockSpec((x.shape[0], TB), lambda i: (0, i)) for x in xs_t]
    const_specs = [pl.BlockSpec(a.shape, lambda i: (0, 0))      # VMEM-resident across grid
                   for a in (w0_args + const_args)]

    out_t = pl.pallas_call(
        _make_kernel(P),
        out_shape=jax.ShapeDtypeStruct((C_PAD, b_pad), jnp.float32),
        grid=(n_tiles,),
        in_specs=x_specs + const_specs,
        out_specs=pl.BlockSpec((C_PAD, TB), lambda i: (0, i)),
        compiler_params=pltpu.CompilerParams(
            dimension_semantics=("parallel",)),        # 2x on v7x (2 TCs); no-op on v5e/v6e
    )(*xs_t, *w0_args, *const_args)

    return out_t[:NCAT, :B].T                          # back to [B, NCAT]


def reference(params, *parent_vals):
    r = params["ref"]
    h = sum(x @ w + b for x, (w, b) in zip(parent_vals, r["parents"]))
    h = _leaky_relu(h)
    h = _leaky_relu(h @ r["wa"] + r["ba"])
    h = _leaky_relu(h @ r["wb"] + r["bb"])
    return h @ r["wf"] + r["bf"]


if __name__ == "__main__":
    key = jax.random.PRNGKey(0)
    parent_dims = (4, 6, 2)          # three parents with small feature widths
    batch = 600                      # not a multiple of TB -> exercises the padded tile path

    k_params, *k_inputs = jax.random.split(key, 1 + len(parent_dims))
    params = init_params(k_params, parent_dims)
    parent_vals = [jax.random.normal(k, (batch, d), jnp.float32)
                   for k, d in zip(k_inputs, parent_dims)]

    out = jax.block_until_ready(cat_feed_forward(params, *parent_vals))
    ref = reference(params, *parent_vals)

    assert out.shape == (batch, NCAT), out.shape
    # bf16 MXU operands vs. pure-f32 reference -> loosened tolerance.
    assert jnp.allclose(out, ref, atol=5e-2, rtol=5e-2), \
        float(jnp.max(jnp.abs(out - ref)))

    print("KERNEL_OK")
</pallas_src>

<mosaic_0001>
module attributes {stable_mosaic.version = 11 : i64} {
  func.func @kernel(%arg0: i32, %arg1: memref<4x256xbf16, #tpu.memory_space<vmem>>, %arg2: memref<6x256xbf16, #tpu.memory_space<vmem>>, %arg3: memref<2x256xbf16, #tpu.memory_space<vmem>>, %arg4: memref<32x4xbf16, #tpu.memory_space<vmem>>, %arg5: memref<32x6xbf16, #tpu.memory_space<vmem>>, %arg6: memref<32x2xbf16, #tpu.memory_space<vmem>>, %arg7: memref<32x1xf32, #tpu.memory_space<vmem>>, %arg8: memref<32x32xbf16, #tpu.memory_space<vmem>>, %arg9: memref<32x1xf32, #tpu.memory_space<vmem>>, %arg10: memref<32x32xbf16, #tpu.memory_space<vmem>>, %arg11: memref<32x1xf32, #tpu.memory_space<vmem>>, %arg12: memref<8x32xbf16, #tpu.memory_space<vmem>>, %arg13: memref<8x1xf32, #tpu.memory_space<vmem>>, %arg14: memref<8x256xf32, #tpu.memory_space<vmem>>) attributes {dimension_semantics = [#tpu.dimension_semantics<parallel>], iteration_bounds = array<i64: 3>, scalar_prefetch = 0 : i64, scratch_operands = 0 : i64, tpu.core_type = #tpu.core_type<tc>, window_params = [{transform_indices = @transform_0, window_bounds = array<i64: 4, 256>}, {transform_indices = @transform_1, window_bounds = array<i64: 6, 256>}, {transform_indices = @transform_2, window_bounds = array<i64: 2, 256>}, {pipeline_mode = #tpu.pipeline_mode<synchronous>, transform_indices = @transform_3, window_bounds = array<i64: 32, 4>}, {pipeline_mode = #tpu.pipeline_mode<synchronous>, transform_indices = @transform_4, window_bounds = array<i64: 32, 6>}, {pipeline_mode = #tpu.pipeline_mode<synchronous>, transform_indices = @transform_5, window_bounds = array<i64: 32, 2>}, {pipeline_mode = #tpu.pipeline_mode<synchronous>, transform_indices = @transform_6, window_bounds = array<i64: 32, 1>}, {pipeline_mode = #tpu.pipeline_mode<synchronous>, transform_indices = @transform_7, window_bounds = array<i64: 32, 32>}, {pipeline_mode = #tpu.pipeline_mode<synchronous>, transform_indices = @transform_8, window_bounds = array<i64: 32, 1>}, {pipeline_mode = #tpu.pipeline_mode<synchronous>, transform_indices = @transform_9, window_bounds = array<i64: 32, 32>}, {pipeline_mode = #tpu.pipeline_mode<synchronous>, transform_indices = @transform_10, window_bounds = array<i64: 32, 1>}, {pipeline_mode = #tpu.pipeline_mode<synchronous>, transform_indices = @transform_11, window_bounds = array<i64: 8, 32>}, {pipeline_mode = #tpu.pipeline_mode<synchronous>, transform_indices = @transform_12, window_bounds = array<i64: 8, 1>}, {transform_indices = @transform_13, window_bounds = array<i64: 8, 256>}]} {
    %c0 = arith.constant 0 : index
    %c0_0 = arith.constant 0 : index
    %0 = vector.load %arg4[%c0, %c0_0] : memref<32x4xbf16, #tpu.memory_space<vmem>>, vector<32x4xbf16>
    %c0_1 = arith.constant 0 : index
    %c0_2 = arith.constant 0 : index
    %1 = vector.load %arg1[%c0_1, %c0_2] : memref<4x256xbf16, #tpu.memory_space<vmem>>, vector<4x256xbf16>
    %cst = arith.constant dense<0.000000e+00> : vector<32x256xf32>
    %2 = tpu.matmul %0, %1, %cst {dimension_numbers = #tpu.dot_dimension_numbers<[1], [0], [0], [1], [0, 0, 1, 1], [], []>} : vector<32x4xbf16>, vector<4x256xbf16>, vector<32x256xf32> -> vector<32x256xf32>
    %c0_3 = arith.constant 0 : index
    %c0_4 = arith.constant 0 : index
    %3 = vector.load %arg5[%c0_3, %c0_4] : memref<32x6xbf16, #tpu.memory_space<vmem>>, vector<32x6xbf16>
    %c0_5 = arith.constant 0 : index
    %c0_6 = arith.constant 0 : index
    %4 = vector.load %arg2[%c0_5, %c0_6] : memref<6x256xbf16, #tpu.memory_space<vmem>>, vector<6x256xbf16>
    %cst_7 = arith.constant dense<0.000000e+00> : vector<32x256xf32>
    %5 = tpu.matmul %3, %4, %cst_7 {dimension_numbers = #tpu.dot_dimension_numbers<[1], [0], [0], [1], [0, 0, 1, 1], [], []>} : vector<32x6xbf16>, vector<6x256xbf16>, vector<32x256xf32> -> vector<32x256xf32>
    %6 = arith.addf %2, %5 : vector<32x256xf32>
    %c0_8 = arith.constant 0 : index
    %c0_9 = arith.constant 0 : index
    %7 = vector.load %arg6[%c0_8, %c0_9] : memref<32x2xbf16, #tpu.memory_space<vmem>>, vector<32x2xbf16>
    %c0_10 = arith.constant 0 : index
    %c0_11 = arith.constant 0 : index
    %8 = vector.load %arg3[%c0_10, %c0_11] : memref<2x256xbf16, #tpu.memory_space<vmem>>, vector<2x256xbf16>
    %cst_12 = arith.constant dense<0.000000e+00> : vector<32x256xf32>
    %9 = tpu.matmul %7, %8, %cst_12 {dimension_numbers = #tpu.dot_dimension_numbers<[1], [0], [0], [1], [0, 0, 1, 1], [], []>} : vector<32x2xbf16>, vector<2x256xbf16>, vector<32x256xf32> -> vector<32x256xf32>
    %10 = arith.addf %6, %9 : vector<32x256xf32>
    %c0_13 = arith.constant 0 : index
    %c0_14 = arith.constant 0 : index
    %11 = vector.load %arg7[%c0_13, %c0_14] : memref<32x1xf32, #tpu.memory_space<vmem>>, vector<32x1xf32>
    %12 = vector.broadcast %11 : vector<32x1xf32> to vector<32x256xf32>
    %13 = arith.addf %10, %12 : vector<32x256xf32>
    %cst_15 = arith.constant 0.000000e+00 : f32
    %14 = vector.broadcast %cst_15 : f32 to vector<32x256xf32>
    %15 = arith.cmpf ogt, %13, %14 : vector<32x256xf32>
    %cst_16 = arith.constant 0.00999999977 : f32
    %16 = vector.broadcast %cst_16 : f32 to vector<32x256xf32>
    %17 = arith.mulf %16, %13 : vector<32x256xf32>
    %18 = arith.select %15, %13, %17 : vector<32x256xi1>, vector<32x256xf32>
    %c0_17 = arith.constant 0 : index
    %c0_18 = arith.constant 0 : index
    %19 = vector.load %arg8[%c0_17, %c0_18] : memref<32x32xbf16, #tpu.memory_space<vmem>>, vector<32x32xbf16>
    %20 = arith.truncf %18 : vector<32x256xf32> to vector<32x256xbf16>
    %cst_19 = arith.constant dense<0.000000e+00> : vector<32x256xf32>
    %21 = tpu.matmul %19, %20, %cst_19 {dimension_numbers = #tpu.dot_dimension_numbers<[1], [0], [0], [1], [0, 0, 1, 1], [], []>} : vector<32x32xbf16>, vector<32x256xbf16>, vector<32x256xf32> -> vector<32x256xf32>
    %c0_20 = arith.constant 0 : index
    %c0_21 = arith.constant 0 : index
    %22 = vector.load %arg9[%c0_20, %c0_21] : memref<32x1xf32, #tpu.memory_space<vmem>>, vector<32x1xf32>
    %23 = vector.broadcast %22 : vector<32x1xf32> to vector<32x256xf32>
    %24 = arith.addf %21, %23 : vector<32x256xf32>
    %cst_22 = arith.constant 0.000000e+00 : f32
    %25 = vector.broadcast %cst_22 : f32 to vector<32x256xf32>
    %26 = arith.cmpf ogt, %24, %25 : vector<32x256xf32>
    %cst_23 = arith.constant 0.00999999977 : f32
    %27 = vector.broadcast %cst_23 : f32 to vector<32x256xf32>
    %28 = arith.mulf %27, %24 : vector<32x256xf32>
    %29 = arith.select %26, %24, %28 : vector<32x256xi1>, vector<32x256xf32>
    %c0_24 = arith.constant 0 : index
    %c0_25 = arith.constant 0 : index
    %30 = vector.load %arg10[%c0_24, %c0_25] : memref<32x32xbf16, #tpu.memory_space<vmem>>, vector<32x32xbf16>
    %31 = arith.truncf %29 : vector<32x256xf32> to vector<32x256xbf16>
    %cst_26 = arith.constant dense<0.000000e+00> : vector<32x256xf32>
    %32 = tpu.matmul %30, %31, %cst_26 {dimension_numbers = #tpu.dot_dimension_numbers<[1], [0], [0], [1], [0, 0, 1, 1], [], []>} : vector<32x32xbf16>, vector<32x256xbf16>, vector<32x256xf32> -> vector<32x256xf32>
    %c0_27 = arith.constant 0 : index
    %c0_28 = arith.constant 0 : index
    %33 = vector.load %arg11[%c0_27, %c0_28] : memref<32x1xf32, #tpu.memory_space<vmem>>, vector<32x1xf32>
    %34 = vector.broadcast %33 : vector<32x1xf32> to vector<32x256xf32>
    %35 = arith.addf %32, %34 : vector<32x256xf32>
    %cst_29 = arith.constant 0.000000e+00 : f32
    %36 = vector.broadcast %cst_29 : f32 to vector<32x256xf32>
    %37 = arith.cmpf ogt, %35, %36 : vector<32x256xf32>
    %cst_30 = arith.constant 0.00999999977 : f32
    %38 = vector.broadcast %cst_30 : f32 to vector<32x256xf32>
    %39 = arith.mulf %38, %35 : vector<32x256xf32>
    %40 = arith.select %37, %35, %39 : vector<32x256xi1>, vector<32x256xf32>
    %c0_31 = arith.constant 0 : index
    %c0_32 = arith.constant 0 : index
    %41 = vector.load %arg12[%c0_31, %c0_32] : memref<8x32xbf16, #tpu.memory_space<vmem>>, vector<8x32xbf16>
    %42 = arith.truncf %40 : vector<32x256xf32> to vector<32x256xbf16>
    %cst_33 = arith.constant dense<0.000000e+00> : vector<8x256xf32>
    %43 = tpu.matmul %41, %42, %cst_33 {dimension_numbers = #tpu.dot_dimension_numbers<[1], [0], [0], [1], [0, 0, 1, 1], [], []>} : vector<8x32xbf16>, vector<32x256xbf16>, vector<8x256xf32> -> vector<8x256xf32>
    %c0_34 = arith.constant 0 : index
    %c0_35 = arith.constant 0 : index
    %44 = vector.load %arg13[%c0_34, %c0_35] : memref<8x1xf32, #tpu.memory_space<vmem>>, vector<8x1xf32>
    %45 = vector.broadcast %44 : vector<8x1xf32> to vector<8x256xf32>
    %46 = arith.addf %43, %45 : vector<8x256xf32>
    %c0_36 = arith.constant 0 : index
    %c0_37 = arith.constant 0 : index
    %47 = vector.load %arg14[%c0_36, %c0_37] : memref<8x256xf32, #tpu.memory_space<vmem>>, vector<8x256xf32>
    tpu.vector_store %arg14[%c0_36, %c0_37], %46 {strides = array<i32>} : memref<8x256xf32, #tpu.memory_space<vmem>>, vector<8x256xf32>,
    return
  }
  func.func @transform_0(%arg0: i32) -> (i32, i32) {
    %c0_i32 = arith.constant 0 : i32
    %c0_i32_0 = arith.constant 0 : i32
    return %c0_i32, %arg0 : i32, i32
  }
  func.func @transform_1(%arg0: i32) -> (i32, i32) {
    %c0_i32 = arith.constant 0 : i32
    %c0_i32_0 = arith.constant 0 : i32
    return %c0_i32, %arg0 : i32, i32
  }
  func.func @transform_2(%arg0: i32) -> (i32, i32) {
    %c0_i32 = arith.constant 0 : i32
    %c0_i32_0 = arith.constant 0 : i32
    return %c0_i32, %arg0 : i32, i32
  }
  func.func @transform_3(%arg0: i32) -> (i32, i32) {
    %c0_i32 = arith.constant 0 : i32
    %c0_i32_0 = arith.constant 0 : i32
    %c0_i32_1 = arith.constant 0 : i32
    return %c0_i32, %c0_i32_0 : i32, i32
  }
  func.func @transform_4(%arg0: i32) -> (i32, i32) {
    %c0_i32 = arith.constant 0 : i32
    %c0_i32_0 = arith.constant 0 : i32
    %c0_i32_1 = arith.constant 0 : i32
    return %c0_i32, %c0_i32_0 : i32, i32
  }
  func.func @transform_5(%arg0: i32) -> (i32, i32) {
    %c0_i32 = arith.constant 0 : i32
    %c0_i32_0 = arith.constant 0 : i32
    %c0_i32_1 = arith.constant 0 : i32
    return %c0_i32, %c0_i32_0 : i32, i32
  }
  func.func @transform_6(%arg0: i32) -> (i32, i32) {
    %c0_i32 = arith.constant 0 : i32
    %c0_i32_0 = arith.constant 0 : i32
    %c0_i32_1 = arith.constant 0 : i32
    return %c0_i32, %c0_i32_0 : i32, i32
  }
  func.func @transform_7(%arg0: i32) -> (i32, i32) {
    %c0_i32 = arith.constant 0 : i32
    %c0_i32_0 = arith.constant 0 : i32
    %c0_i32_1 = arith.constant 0 : i32
    return %c0_i32, %c0_i32_0 : i32, i32
  }
  func.func @transform_8(%arg0: i32) -> (i32, i32) {
    %c0_i32 = arith.constant 0 : i32
    %c0_i32_0 = arith.constant 0 : i32
    %c0_i32_1 = arith.constant 0 : i32
    return %c0_i32, %c0_i32_0 : i32, i32
  }
  func.func @transform_9(%arg0: i32) -> (i32, i32) {
    %c0_i32 = arith.constant 0 : i32
    %c0_i32_0 = arith.constant 0 : i32
    %c0_i32_1 = arith.constant 0 : i32
    return %c0_i32, %c0_i32_0 : i32, i32
  }
  func.func @transform_10(%arg0: i32) -> (i32, i32) {
    %c0_i32 = arith.constant 0 : i32
    %c0_i32_0 = arith.constant 0 : i32
    %c0_i32_1 = arith.constant 0 : i32
    return %c0_i32, %c0_i32_0 : i32, i32
  }
  func.func @transform_11(%arg0: i32) -> (i32, i32) {
    %c0_i32 = arith.constant 0 : i32
    %c0_i32_0 = arith.constant 0 : i32
    %c0_i32_1 = arith.constant 0 : i32
    return %c0_i32, %c0_i32_0 : i32, i32
  }
  func.func @transform_12(%arg0: i32) -> (i32, i32) {
    %c0_i32 = arith.constant 0 : i32
    %c0_i32_0 = arith.constant 0 : i32
    %c0_i32_1 = arith.constant 0 : i32
    return %c0_i32, %c0_i32_0 : i32, i32
  }
  func.func @transform_13(%arg0: i32) -> (i32, i32) {
    %c0_i32 = arith.constant 0 : i32
    %c0_i32_0 = arith.constant 0 : i32
    return %c0_i32, %arg0 : i32, i32
  }
}

</mosaic_0001>

<bundles_post_ra>
// kernel: tpu_custom_call.1
= control target key start
LH: loop header
LB: loop body
LE: loop exit
PB: predicated region body
PF: predicated region fallthrough
CT: control target
= control target key end

     0   :  { %18 = vsyncpa [#allocation3], 0  ;;  %s1685_s0 = inlined_call_operand.vmem [shape: bf16[4,768], index: 0, kind: input, shape index: {}]   ;;  %s1686_s1 = inlined_call_operand.vmem [shape: bf16[6,768], index: 1, kind: input, shape index: {}]   ;;  %s1687_s2 = inlined_call_operand.vmem [shape: bf16[2,768], index: 2, kind: input, shape index: {}]   ;;  %s1688_s3 = inlined_call_operand.vmem [shape: bf16[32,4], index: 3, kind: input, shape index: {}]   ;;  %s1689_s4 = inlined_call_operand.vmem [shape: bf16[32,6], index: 4, kind: input, shape index: {}]   ;;  %s1690_s5 = inlined_call_operand.vmem [shape: bf16[32,2], index: 5, kind: input, shape index: {}]   ;;  %s1691_s6 = inlined_call_operand.vmem [shape: f32[32,1], index: 6, kind: input, shape index: {}]   ;;  %s1692_s7 = inlined_call_operand.vmem [shape: bf16[32,32], index: 7, kind: input, shape index: {}]   ;;  %s1693_s8 = inlined_call_operand.vmem [shape: f32[32,1], index: 8, kind: input, shape index: {}]   ;;  %s1694_s9 = inlined_call_operand.vmem [shape: bf16[32,32], index: 9, kind: input, shape index: {}]   ;;  %s1695_s10 = inlined_call_operand.vmem [shape: f32[32,1], index: 10, kind: input, shape index: {}]   ;;  %s1696_s11 = inlined_call_operand.vmem [shape: bf16[8,32], index: 11, kind: input, shape index: {}]   ;;  %s1697_s12 = inlined_call_operand.vmem [shape: f32[8,1], index: 12, kind: input, shape index: {}]   ;;  %s1698_s13 = inlined_call_operand.hbm [shape: f32[8,768], index: 13, kind: output, shape index: {}]  }
   0x1   :  { %20 = vsyncpa [#allocation3 + $0x1], 0  ;;  %s1486_s25 = smov 0   ;;  %s1488_s26 = smov 0  }
   0x2   :  { %s1490_s27 = smov 0   ;;  %s1492_s28 = smov 0  }
   0x3 LB: > { %1703 = sst [smem:[#allocation5_spill]] %s1407_s27  ;;  %s1507_s29 = sadd.s32 4294967295, %s1411_s28   ;;  %s1411_s28 = sphi %s1492_s28, %s1710_s28   ;;  %s1407_s27 = sphi %s1490_s27, %s1712_s27   ;;  %s1403_s26 = sphi %s1488_s26, %s1714_s26   ;;  %s1399_s25 = sphi %s1486_s25, %s1713_s25  }
   0x4   : > { %s1234_s30 = sadd.s32 4294967294, %s1411_s28   ;;  %s1511_s14 = sadd.s32 1, %s1411_s28  }
   0x5   : > { %1704 = sst [smem:[#allocation6_spill]] %s1511_s14  ;;  %s321_s15 = sadd.s32 1, %s1407_s27 }
   0x6   : > { %s318_s16 = ssub.s32 %s1411_s28, %s1511_s14  ;;  %p331_p0 = scmp.ne.s32.totalorder %s1407_s27, %s1403_s26 }
   0x7   : > { %p319_p1 = scmp.eq.s32.totalorder %s318_s16, 0  ;;  %p332_p2 = scmp.eq.s32.totalorder %s1507_s29, 2 }
   0x8   : > { %p337_p3 = scmp.ne.s32.totalorder %s1403_s26, %s1399_s25  ;;  %p338_p4 = scmp.eq.s32.totalorder %s1234_s30, 2 }
   0x9   : > { %s1522_s17 = scalar_select %p319_p1, %s1407_s27, %s321_s15  }
   0xa   : > { %p1524_p5 = por %p332_p2, %p331_p0  ;;  %p1528_p6 = por %p338_p4, %p337_p3 }
   0xb   : > { %1705 = sst [smem:[#allocation7_spill]] %s1522_s17  ;;  %p1237_p7 = scmp.ge.s32.totalorder %s1411_s28, 1 }
   0xc   : > { %s1707_s19 = scalar_select %p1528_p6, 1, 0 }
   0xd   : > { %p412_p8 = scmp.lt.s32.totalorder %s1411_s28, 4 }
   0xe   : > { %1708 = sst [smem:[#allocation8_spill]] %s1707_s19 }
   0xf   : > { %p413_p9 = pnand %p1237_p7, %p412_p8 }
  0x10   : > { %s1239_s20 = sshll.u32 (!%p413_p9), %s1507_s29, 1  ;;  %v689_v0 = vlaneseq (!%p413_p9)  ;;  %v1413_v1 = vmov (!%p413_p9), 0   ;;  %v1414_v3 = vmov (!%p413_p9), 1966171168   ;;  %vm516_vm0 = vcmask (!%p413_p9), 1042432   ;;  %v775_v14 = vld [vmem:[%s1691_s6] sm:$0xff] (!%p413_p9) }
  0x11   : > { %416 = sbr.rel (%p413_p9) target bundleno = 997 (0x3e5), region = 72  ;;  %p466_p10 = scmp.lt.s32.totalorder (!%p413_p9), %s1239_s20, 5  ;;  %555 = vmatprep.mubr.bf16.mxu0 (!%p413_p9), %v1413_v1  ;;  %1335 = vset.pattern.permute.xlu0 (!%p413_p9), %v1413_v1  ;;  %v687_v4 = vunpack.c.l.s4 (!%p413_p9), %v1414_v3  ;;  %vm602_vm1 = vcmask (!%p413_p9), 1041408   ;;  %v1339_v16 = vld [vmem:[%s1689_s4] sm:$0xff] (!%p413_p9)   ;;  %v777_v17 = vld [vmem:[%s1691_s6 + $0x10] sm:$0xff] (!%p413_p9)  ;;  %vm509_vm2 = vcmask (!%p413_p9), 48128  }
  0x12   : > { %1336 = vset.pattern.permute.xlu1 (!%p413_p9), %v1413_v1  ;;  %912 = vmatprep.mubr.bf16.mxu1 (!%p413_p9), %v1413_v1  ;;  %v690_v2 = vshrl.u32 (!%p413_p9), %v689_v0, 7  ;;  %v776_v18 = vld [vmem:[%s1691_s6 + $0x8] sm:$0xff] (!%p413_p9)  ;;  %vm707_vm3 = vcmask (!%p413_p9), 1040384   ;;  %v839_v21 = vld [vmem:[%s1693_s8] sm:$0xff] (!%p413_p9)  ;;  %v778_v22 = vld [vmem:[%s1691_s6 + $0x18] sm:$0xff] (!%p413_p9)  ;;  %vm595_vm4 = vcmask (!%p413_p9), 31744  }
  0x13   : > { %v688_v7 = vunpack.c.0.s8 (!%p413_p9), %v687_v4  ;;  %781 = vperm.xlu0 (!%p413_p9), %1335, %v775_v14   ;;  %791 = vperm.xlu1 (!%p413_p9), %1336, %v777_v17   ;;  %v840_v23 = vld [vmem:[%s1693_s8 + $0x8] sm:$0xff] (!%p413_p9)  ;;  %v841_v25 = vld [vmem:[%s1693_s8 + $0x10] sm:$0xff] (!%p413_p9)  ;;  %v842_v26 = vld [vmem:[%s1693_s8 + $0x18] sm:$0xff] (!%p413_p9)  ;;  %vm700_vm5 = vcmask (!%p413_p9), 15360   ;;  %vm873_vm14 = vcmask (!%p413_p9), 261120  }
  0x14   : > { %v1340_v24 = vld [vmem:[%s1689_s4 + $0x8] sm:$0xff] (!%p413_p9)   ;;  %v965_v27 = vld [vmem:[%s1695_s10] sm:$0xff] (!%p413_p9)  ;;  %v967_v31 = vld [vmem:[%s1695_s10 + $0x10] sm:$0xff] (!%p413_p9) }
  0x15   : > { %v691_v13 = vsub.s32 (!%p413_p9), %v688_v7, %v690_v2  ;;  %v966_v29 = vld [vmem:[%s1695_s10 + $0x8] sm:$0xff] (!%p413_p9)  ;;  %v1341_v30 = vld [vmem:[%s1688_s3] sm:$0xff] (!%p413_p9)   ;;  %v968_v33 = vld [vmem:[%s1695_s10 + $0x18] sm:$0xff] (!%p413_p9) }
  0x16   : > { %v1087_v34 = vld [vmem:[%s1697_s12] sm:$0xff] (!%p413_p9)  ;;  %v1342_v35 = vld [vmem:[%s1688_s3 + $0x8] sm:$0xff] (!%p413_p9)  }
  0x17   : > { %786 = vperm.xlu0 (!%p413_p9), %1335, %v776_v18   ;;  %796 = vperm.xlu1 (!%p413_p9), %1336, %v778_v22   ;;  %v1343_v36 = vld [vmem:[%s1690_s5] sm:$0xff] (!%p413_p9)   ;;  %v1344_v37 = vld [vmem:[%s1690_s5 + $0x8] sm:$0xff] (!%p413_p9)  }
  0x18   : > { %s1716_s20 = smov (!%p466_p10, %s1239_s20), 5 }
  0x19   : > { %s1242_s21 = sshll.u32 %s1716_s20, 2  ;;  %s1240_s22 = sshll.u32 %s1716_s20, 1 }
  0x1a   : > { %s475_s30 = scalar_lea.vmem %s1686_s1, %s1242_s21  ;;  %s469_s17 = scalar_lea.vmem %s1685_s0, %s1240_s22 }
  0x1b   : > { %v493_v5 = vld [vmem:[%s475_s30] sm:$0x77]  ;;  %s480_s19 = scalar_lea.vmem %s1687_s2, %s1716_s20  ;;  %845 = vperm.xlu0 %1335, %v839_v21   ;;  %850 = vperm.xlu1 %1336, %v840_v23   ;;  %s462_s21 = sand.u32 1, %s1403_s26  }
  0x1c   : > { %v1253_v6 = vld.sshfl [vmem:[%s469_s17] sm:$0x33 pattern:$0x76325410]  ;;  %v1247_v8 = vcombine.high %v493_v5, %v493_v5  ;;  %v1246_v9 = vcombine.low %v493_v5, %v493_v5  ;;  %s1238_s23 = sshll.u32 %s462_s21, 4  ;;  %s1277_s22 = sshll.u32 %s1507_s29, 8 }
  0x1d   : > { %v594_v10 = vcombine.high %v1253_v6, %v1253_v6  ;;  %v1259_v11 = vld.sshfl [vmem:[%s480_s19] sm:$0x11 pattern:$0x75316420]  ;;  %v604_v19 = vsel %vm602_vm1, %v1253_v6, 0  ;;  %s464_s17 = scalar_lea.vmem [#allocation2], %s1238_s23  ;;  %s1643_s20 = scalar_lea.hbm %s1698_s13, %s1277_s22 }
  0x1e   : > { %v685_v12 = vcombine.high %v1259_v11, %v1259_v11  ;;  %1248 = vmatprep.subr.msk.bf16.mxu0 %vm516_vm0, %v1247_v8  ;;  %v518_v15 = vsel %vm516_vm0, %v1246_v9, 0  ;;  %v692_v28 = vrot.slane %v1259_v11, %v691_v13  ;;  %s1154_s27 = sshll.u32 %s464_s17, 4  ;;  %s1140_s29 = scalar_lea.sflag [#allocation3], %s462_s21  ;;  %s1645_s27 = int_to_ptr.vmem [resolvable:$true] %s1154_s27 }
  0x1f   : > { %524 = vmatpush1.bf16.msra.mxu0 %v518_v15  ;;  %855 = vperm.xlu0 %1335, %v841_v25   ;;  %v1345_v15 = vld [vmem:[%s1692_s7] sm:$0xff]   ;;  %s1349_s24 = scalar_lea.vmem %s1645_s27, 256  ;;  %s1415_s30 = smov [#allocation2]  }
  0x20   : > { %1254 = vmatprep.subr.msk.bf16.mxu0 %vm602_vm1, %v594_v10  ;;  %v699_v20 = vrot.slane %v685_v12, %v691_v13  ;;  %860 = vperm.xlu1 %1336, %v842_v26   ;;  %v709_v32 = vsel %vm707_vm3, %v692_v28, 0  ;;  %p1350_p11 = scmp.ne.s32.totalorder %s1645_s27, %s1349_s24  ;;  %s1353_s15 = sshll.u32 %s1415_s30, 4  ;;  %s1354_s15 = int_to_ptr.vmem [resolvable:$false] %s1353_s15 }
  0x21   : > { %s1355_s16 = scalar_lea.vmem %s1354_s15, 512  ;;  %p1356_p0 = scmp.lt.s32.totalorder %s1645_s27, %s1354_s15 }
  0x22   : > { %1249 = vmatmul.mubr.msk.bf16.vlgmr.msra.gmra.mrb[0].mxu0 %vm509_vm2, %v1339_v16  ;;  %v1346_v16 = vld [vmem:[%s1692_s7 + $0x8] sm:$0xff]   ;;  %p1351_p12 = pnand %p1350_p11, %p1524_p5  ;;  %p1357_p1 = scmp.lt.s32.totalorder %s1355_s16, %s1349_s24 }
  0x23   : > { %610 = vmatpush1.bf16.msra.mxu0 %v604_v19  ;;  %565 = vmatprep.mubr.bf16.mxu0 %v1413_v1 }
  0x24   : > { %1260 = vmatprep.subr.msk.bf16.mxu0 %vm707_vm3, %v699_v20  ;;  %971 = vperm.xlu0 %1335, %v965_v27   ;;  %p1352_p13 = pneg %p1351_p12  ;;  %p1358_p2 = por %p1357_p1, %p1356_p0 }
  0x25   : > { %976 = vperm.xlu1 %1336, %v966_v29  }
  0x26   : > { %p1359_p3 = pnand %p1358_p2, %p1352_p13 }
  0x28   : > { %981 = vperm.xlu0 %1335, %v967_v31  }
  0x29   : > { %986 = vperm.xlu1 %1336, %v968_v33  }
  0x2a   : > { %1250 = vmatmul.mubr.msk.bf16.gmra.mrb[4].mxu0 %vm509_vm2, %v1340_v24 }
  0x2b   : > { %641 = vmatprep.mubr.bf16.mxu0 %v1413_v1 }
  0x2c   : > { %1090 = vperm.xlu0 %1335, %v1087_v34  }
  0x32   : > { %1255 = vmatmul.mubr.msk.bf16.vlgmr.msra.gmra.mrb[0].mxu0 %vm595_vm4, %v1341_v30 }
  0x33   : > { %715 = vmatpush1.bf16.msra.mxu0 %v709_v32  ;;  %651 = vmatprep.mubr.bf16.mxu0 %v1413_v1 }
  0x3a   : > { %1256 = vmatmul.mubr.msk.bf16.gmra.mrb[4].mxu0 %vm595_vm4, %v1342_v35 }
  0x3b   : > { %746 = vmatprep.mubr.bf16.mxu0 %v1413_v1 }
  0x42   : > { %1261 = vmatmul.mubr.msk.bf16.vlgmr.msra.gmra.mrb[0].mxu0 %vm700_vm5, %v1343_v36 }
  0x43   : > { %756 = vmatprep.mubr.bf16.mxu0 %v1413_v1 }
  0x4a   : > { %1262 = vmatmul.mubr.msk.bf16.gmra.mrb[4].mxu0 %vm700_vm5, %v1344_v37 }
  0x92   : > { %v782_v38 = vpop.permute.xlu0 %781  ;;  %v792_v48 = vpop.permute.xlu1 %791 }
  0x96   : > { %v787_v42 = vpop.permute.xlu0 %786  ;;  %v797_v62 = vpop.permute.xlu1 %796 }
  0x9a   : > { %v846_v17 = vpop.permute.xlu0 %845  ;;  %v851_v21 = vpop.permute.xlu1 %850 }
  0x9e   : > { %v856_v33 = vpop.permute.xlu0 %855 }
 0x115   : > { %v748_v39 = vpop.f32.mrb[0].mxu0 }
 0x116   : > { %v799_v40 = vadd.f32 %v782_v38, %v748_v39  ;;  %v750_v41 = vpop.f32.mrb[1].mxu0 }
 0x117   : > { %v800_v43 = vadd.f32 %v782_v38, %v750_v41  ;;  %v752_v44 = vpop.f32.mrb[2].mxu0  ;;  %v861_v41 = vpop.permute.xlu1 %860 }
 0x118   : > { %v815_v45 = vmul.f32 0.01, %v799_v40  ;;  %v801_v46 = vadd.f32 %v787_v42, %v752_v44  ;;  %v754_v47 = vpop.f32.mrb[3].mxu0  ;;  %vm807_vm6 = vcmp.gt.f32.partialorder %v799_v40, 0.0 }
 0x119   : > { %v816_v49 = vmul.f32 0.01, %v800_v43  ;;  %v802_v50 = vadd.f32 %v787_v42, %v754_v47  ;;  %vm808_vm7 = vcmp.gt.f32.partialorder %v800_v43, 0.0 }
 0x11a   : > { %v817_v51 = vmul.f32 0.01, %v801_v46  ;;  %vm809_vm8 = vcmp.gt.f32.partialorder %v801_v46, 0.0  ;;  %v823_v53 = vsel %vm807_vm6, %v799_v40, %v815_v45 }
 0x11b   : > { %v818_v52 = vmul.f32 0.01, %v802_v50  ;;  %vm810_vm9 = vcmp.gt.f32.partialorder %v802_v50, 0.0  ;;  %v824_v56 = vsel %vm808_vm7, %v800_v43, %v816_v49 }
 0x11c   : > { %v825_v54 = vsel %vm809_vm8, %v801_v46, %v817_v51 }
 0x11d   : > { %v758_v55 = vpop.f32.mrb[4].mxu0  ;;  %v826_v57 = vsel %vm810_vm9, %v802_v50, %v818_v52  ;;  %v835_v58 = vpack.c.bf16 %v825_v54, %v823_v53 }
 0x11e   : > { %v803_v59 = vadd.f32 %v792_v48, %v758_v55  ;;  %v760_v60 = vpop.f32.mrb[5].mxu0  ;;  %v836_v61 = vpack.c.bf16 %v826_v57, %v824_v56  ;;  %v1347_v57 = vld [vmem:[%s1694_s9] sm:$0xff]  }
 0x11f   : > { %v804_v63 = vadd.f32 %v792_v48, %v760_v60  ;;  %v762_v0 = vpop.f32.mrb[6].mxu0 }
 0x120   : > { %v819_v2 = vmul.f32 0.01, %v803_v59  ;;  %v805_v3 = vadd.f32 %v797_v62, %v762_v0  ;;  %v764_v4 = vpop.f32.mrb[7].mxu0  ;;  %880 = vmatprep.subr.bf16.mxu1 %v836_v61  ;;  %vm811_vm10 = vcmp.gt.f32.partialorder %v803_v59, 0.0 }
 0x121   : > { %v820_v5 = vmul.f32 0.01, %v804_v63  ;;  %v806_v6 = vadd.f32 %v797_v62, %v764_v4  ;;  %881 = vmatpush1.bf16.msra.mxu1 %v835_v58  ;;  %vm812_vm11 = vcmp.gt.f32.partialorder %v804_v63, 0.0  ;;  %v1348_v58 = vld [vmem:[%s1694_s9 + $0x8] sm:$0xff]  }
 0x122   : > { %vm813_vm12 = vcmp.gt.f32.partialorder %v805_v3, 0.0  ;;  %v821_v7 = vmul.f32 0.01, %v805_v3  ;;  %v827_v9 = vsel %vm811_vm10, %v803_v59, %v819_v2  ;;  %v972_v59 = vpop.permute.xlu0 %971 }
 0x123   : > { %vm814_vm13 = vcmp.gt.f32.partialorder %v806_v6, 0.0  ;;  %v822_v8 = vmul.f32 0.01, %v806_v6  ;;  %v828_v11 = vsel %vm812_vm11, %v804_v63, %v820_v5  ;;  %v977_v63 = vpop.permute.xlu1 %976 }
 0x124   : > { %v829_v10 = vsel %vm813_vm12, %v805_v3, %v821_v7 }
 0x125   : > { %v830_v12 = vsel %vm814_vm13, %v806_v6, %v822_v8  ;;  %v837_v13 = vpack.c.bf16 %v829_v10, %v827_v9 }
 0x126   : > { %v838_v14 = vpack.c.bf16 %v830_v12, %v828_v11  ;;  %v982_v11 = vpop.permute.xlu0 %981 }
 0x128   : > { %882 = vmatprep.subr.bf16.mxu1 %v838_v14 }
 0x129   : > { %883 = vmatpush1.bf16.msra.mxu1 %v837_v13 }
 0x12c   : > { %1265 = vmatmul.mubr.msk.bf16.vlgmr.msra.gmra.mrb[0].mxu1 %vm873_vm14, %v1345_v15 }
 0x12d   : > { %922 = vmatprep.mubr.bf16.mxu1 %v1413_v1 }
 0x134   : > { %1266 = vmatmul.mubr.msk.bf16.gmra.mrb[4].mxu1 %vm873_vm14, %v1346_v16 }
 0x135   : > { %1037 = vmatprep.mubr.bf16.mxu1 %v1413_v1 }
 0x1ff   : > { %v914_v18 = vpop.f32.mrb[0].mxu1 }
 0x200   : > { %v915_v19 = vadd.f32 %v914_v18, %v846_v17  ;;  %v916_v20 = vpop.f32.mrb[1].mxu1 }
 0x201   : > { %v917_v22 = vadd.f32 %v916_v20, %v846_v17  ;;  %v918_v23 = vpop.f32.mrb[2].mxu1 }
 0x202   : > { %v941_v24 = vmul.f32 0.01, %v915_v19  ;;  %v919_v25 = vadd.f32 %v918_v23, %v851_v21  ;;  %v920_v26 = vpop.f32.mrb[3].mxu1  ;;  %vm933_vm15 = vcmp.gt.f32.partialorder %v915_v19, 0.0 }
 0x203   : > { %v942_v27 = vmul.f32 0.01, %v917_v22  ;;  %v921_v28 = vadd.f32 %v920_v26, %v851_v21  ;;  %vm934_vm0 = vcmp.gt.f32.partialorder %v917_v22, 0.0 }
 0x204   : > { %vm935_vm1 = vcmp.gt.f32.partialorder %v919_v25, 0.0  ;;  %v943_v29 = vmul.f32 0.01, %v919_v25  ;;  %v949_v31 = vsel %vm933_vm15, %v915_v19, %v941_v24  ;;  %v987_v19 = vpop.permute.xlu1 %986 }
 0x205   : > { %vm936_vm2 = vcmp.gt.f32.partialorder %v921_v28, 0.0  ;;  %v944_v30 = vmul.f32 0.01, %v921_v28  ;;  %v950_v36 = vsel %vm934_vm0, %v917_v22, %v942_v27 }
 0x206   : > { %v951_v32 = vsel %vm935_vm1, %v919_v25, %v943_v29 }
 0x207   : > { %v961_v34 = vpack.c.bf16 %v951_v32, %v949_v31  ;;  %v924_v35 = vpop.f32.mrb[4].mxu1  ;;  %v952_v37 = vsel %vm936_vm2, %v921_v28, %v944_v30 }
 0x208   : > { %v925_v38 = vadd.f32 %v924_v35, %v856_v33  ;;  %v926_v39 = vpop.f32.mrb[5].mxu1  ;;  %v962_v40 = vpack.c.bf16 %v952_v37, %v950_v36  ;;  %v1082_v35 = vld [vmem:[%s1696_s11] sm:$0xf]  ;;  %v1091_v36 = vpop.permute.xlu0 %1090 }
 0x209   : > { %v927_v42 = vadd.f32 %v926_v39, %v856_v33  ;;  %v928_v43 = vpop.f32.mrb[6].mxu1 }
 0x20a   : > { %v945_v44 = vmul.f32 0.01, %v925_v38  ;;  %v929_v45 = vadd.f32 %v928_v43, %v861_v41  ;;  %v930_v46 = vpop.f32.mrb[7].mxu1  ;;  %1005 = vmatprep.subr.bf16.mxu1 %v962_v40  ;;  %vm937_vm3 = vcmp.gt.f32.partialorder %v925_v38, 0.0 }
 0x20b   : > { %v946_v47 = vmul.f32 0.01, %v927_v42  ;;  %v931_v48 = vadd.f32 %v930_v46, %v861_v41  ;;  %1006 = vmatpush1.bf16.msra.mxu1 %v961_v34  ;;  %vm938_vm4 = vcmp.gt.f32.partialorder %v927_v42, 0.0 }
 0x20c   : > { %vm939_vm5 = vcmp.gt.f32.partialorder %v929_v45, 0.0  ;;  %v947_v49 = vmul.f32 0.01, %v929_v45  ;;  %v953_v51 = vsel %vm937_vm3, %v925_v38, %v945_v44 }
 0x20d   : > { %vm940_vm6 = vcmp.gt.f32.partialorder %v931_v48, 0.0  ;;  %v948_v50 = vmul.f32 0.01, %v931_v48  ;;  %v954_v54 = vsel %vm938_vm4, %v927_v42, %v946_v47 }
 0x20e   : > { %v955_v52 = vsel %vm939_vm5, %v929_v45, %v947_v49 }
 0x20f   : > { %v963_v53 = vpack.c.bf16 %v955_v52, %v953_v51  ;;  %v956_v55 = vsel %vm940_vm6, %v931_v48, %v948_v50 }
 0x210   : > { %v964_v56 = vpack.c.bf16 %v956_v55, %v954_v54 }
 0x212   : > { %1007 = vmatprep.subr.bf16.mxu1 %v964_v56 }
 0x213   : > { %1008 = vmatpush1.bf16.msra.mxu1 %v963_v53 }
 0x216   : > { %1269 = vmatmul.mubr.msk.bf16.vlgmr.msra.gmra.mrb[8].mxu1 %vm873_vm14, %v1347_v57 }
 0x217   : > { %1047 = vmatprep.mubr.bf16.mxu1 %v1413_v1 }
 0x21e   : > { %1270 = vmatmul.mubr.msk.bf16.gmra.mrb[12].mxu1 %vm873_vm14, %v1348_v58 }
 0x21f   : > { %1128 = vmatprep.mubr.bf16.mxu1 %v1413_v1 }
 0x2e9   : > { %v1039_v60 = vpop.f32.mrb[8].mxu1 }
 0x2ea   : > { %v1040_v61 = vadd.f32 %v1039_v60, %v972_v59  ;;  %v1041_v62 = vpop.f32.mrb[9].mxu1 }
 0x2eb   : > { %v1042_v0 = vadd.f32 %v1041_v62, %v972_v59  ;;  %v1043_v2 = vpop.f32.mrb[10].mxu1 }
 0x2ec   : > { %v1066_v3 = vmul.f32 0.01, %v1040_v61  ;;  %v1044_v4 = vadd.f32 %v1043_v2, %v977_v63  ;;  %v1045_v5 = vpop.f32.mrb[11].mxu1  ;;  %vm1058_vm7 = vcmp.gt.f32.partialorder %v1040_v61, 0.0 }
 0x2ed   : > { %v1067_v6 = vmul.f32 0.01, %v1042_v0  ;;  %v1046_v7 = vadd.f32 %v1045_v5, %v977_v63  ;;  %vm1059_vm8 = vcmp.gt.f32.partialorder %v1042_v0, 0.0 }
 0x2ee   : > { %vm1060_vm9 = vcmp.gt.f32.partialorder %v1044_v4, 0.0  ;;  %v1068_v8 = vmul.f32 0.01, %v1044_v4  ;;  %v1074_v10 = vsel %vm1058_vm7, %v1040_v61, %v1066_v3 }
 0x2ef   : > { %vm1061_vm10 = vcmp.gt.f32.partialorder %v1046_v7, 0.0  ;;  %v1069_v9 = vmul.f32 0.01, %v1046_v7  ;;  %v1075_v14 = vsel %vm1059_vm8, %v1042_v0, %v1067_v6 }
 0x2f0   : > { %v1076_v1 = vsel %vm1060_vm9, %v1044_v4, %v1068_v8 }
 0x2f1   : > { %v1083_v12 = vpack.c.bf16 %v1076_v1, %v1074_v10  ;;  %v1049_v13 = vpop.f32.mrb[12].mxu1  ;;  %v1077_v15 = vsel %vm1061_vm10, %v1046_v7, %v1069_v9 }
 0x2f2   : > { %v1050_v16 = vadd.f32 %v1049_v13, %v982_v11  ;;  %v1051_v17 = vpop.f32.mrb[13].mxu1  ;;  %v1084_v18 = vpack.c.bf16 %v1077_v15, %v1075_v14 }
 0x2f3   : > { %v1052_v20 = vadd.f32 %v1051_v17, %v982_v11  ;;  %v1053_v21 = vpop.f32.mrb[14].mxu1 }
 0x2f4   : > { %v1070_v22 = vmul.f32 0.01, %v1050_v16  ;;  %v1054_v23 = vadd.f32 %v1053_v21, %v987_v19  ;;  %v1055_v24 = vpop.f32.mrb[15].mxu1  ;;  %1096 = vmatprep.subr.bf16.mxu1 %v1084_v18  ;;  %vm1062_vm11 = vcmp.gt.f32.partialorder %v1050_v16, 0.0 }
 0x2f5   : > { %v1071_v25 = vmul.f32 0.01, %v1052_v20  ;;  %v1056_v26 = vadd.f32 %v1055_v24, %v987_v19  ;;  %1097 = vmatpush1.bf16.msra.mxu1 %v1083_v12  ;;  %vm1063_vm12 = vcmp.gt.f32.partialorder %v1052_v20, 0.0 }
 0x2f6   : > { %vm1064_vm13 = vcmp.gt.f32.partialorder %v1054_v23, 0.0  ;;  %v1072_v27 = vmul.f32 0.01, %v1054_v23  ;;  %v1078_v29 = vsel %vm1062_vm11, %v1050_v16, %v1070_v22 }
 0x2f7   : > { %vm1065_vm15 = vcmp.gt.f32.partialorder %v1056_v26, 0.0  ;;  %v1073_v28 = vmul.f32 0.01, %v1056_v26  ;;  %v1079_v32 = vsel %vm1063_vm12, %v1052_v20, %v1071_v25 }
 0x2f8   : > { %v1080_v30 = vsel %vm1064_vm13, %v1054_v23, %v1072_v27 }
 0x2f9   : > { %v1085_v31 = vpack.c.bf16 %v1080_v30, %v1078_v29  ;;  %v1081_v33 = vsel %vm1065_vm15, %v1056_v26, %v1073_v28 }
 0x2fa   : > { %v1086_v34 = vpack.c.bf16 %v1081_v33, %v1079_v32 }
 0x2fc   : > { %1098 = vmatprep.subr.bf16.mxu1 %v1086_v34 }
 0x2fd   : > { %1099 = vmatpush1.bf16.msra.mxu1 %v1085_v31 }
 0x300   : > { %1271 = vmatmul.mubr.msk.bf16.vlgmr.msra.gmra.mrb[16].mxu1 %vm873_vm14, %v1082_v35 }
 0x3d3   : > { %v1130_v37 = vpop.f32.mrb[16].mxu1 }
 0x3d4   : > { %v1131_v38 = vadd.f32 %v1130_v37, %v1091_v36  ;;  %v1132_v39 = vpop.f32.mrb[17].mxu1 }
 0x3d5   : > { %v1133_v40 = vadd.f32 %v1132_v39, %v1091_v36  ;;  %v1134_v41 = vpop.f32.mrb[18].mxu1 }
 0x3d6   : > { %1137 = vst [vmem:[%s464_s17] sm:$0xff] %v1131_v38  ;;  %v1135_v42 = vpop.f32.mrb[19].mxu1 }
 0x3d7   : > { %1138 = vst [vmem:[%s464_s17 + $0x8] sm:$0xff] %v1133_v40 }
 0x3d8   : > { %1362 = shalt.err (!%p1359_p3)
}
 0x3d9   : > { %s1363_s21 = scalar_lea.hbm %s1643_s20, 256  ;;  %s1367_s17 = scalar_lea.hbm %s1698_s13, 768 }
 0x3da   : > { %p1364_p4 = scmp.ne.s32.totalorder %s1643_s20, %s1363_s21  ;;  %p1368_p9 = scmp.lt.u32.totalorder %s1643_s20, %s1698_s13 }
 0x3db   : > { %p1369_p10 = scmp.lt.u32.totalorder %s1367_s17, %s1363_s21  ;;  %p1371_p12 = scmp.lt.u32.totalorder %s1363_s21, %s1643_s20 }
 0x3dc   : > { %p1365_p7 = pnand %p1364_p4, %p1524_p5 }
 0x3dd   : > { %p1370_p11 = por %p1369_p10, %p1368_p9 }
 0x3de   : > { %p1366_p8 = pneg %p1365_p7 }
 0x3df   : > { %p1372_p13 = por %p1371_p12, %p1370_p11 }
 0x3e1   : > { %p1373_p0 = pnand %p1372_p13, %p1366_p8 }
 0x3e3   : > { %1376 = shalt.err (!%p1373_p0)
}
 0x3e4   : > { %1294 = dma.vmem_to_hbm [thread:$0]  (%p1524_p5), %s1645_s27, 256, %s1643_s20, %s1140_s29  }
 0x3e5 PF: > { %p1300_p1 = scmp.ge.s32.totalorder %s1411_s28, 2  ;;  %s1166_s30 = sand.u32 1, %s1399_s25  }
 0x3e6   : > { %s1167_s15 = scalar_lea.sflag [#allocation3], %s1166_s30 }
 0x3e7   : > { %p1297_p2 = pnand %p1300_p1, %p1528_p6 }
 0x3e9   : > { %1394 = dma.done.wait (!%p1297_p2), %s1167_s15, 256  }
 0x3ea   : > { %1396 = vsyncadd (!%p1297_p2), %s1167_s15, 4294967040  ;;  %s1710_s28 = sld [smem:[#allocation6_spill]]  ;;  %s1711_s16 = sld [smem:[#allocation5_spill]] }
 0x3eb   : > { %s1712_s27 = sld [smem:[#allocation7_spill]]  ;;  %s1713_s25 = smov %s1403_s26 }
 0x3f0   : > { %p23_p3 = scmp.ge.s32.totalorder %s1710_s28, 5   ;;  %s1714_s26 = smov %s1711_s16 }
 0x3f2   :  { %25 = sbr.rel (!%p23_p3) target bundleno = 3 (0x3), region = 113 }
 0x3f9   :  { %1172 = vsyncpa [#allocation3], 1 }
 0x3fa   :  { %1174 = vsyncpa [#allocation3 + $0x1], 1 }

</bundles_post_ra>
